<compile_context>
chip_gen: v6e
topology: v6e:2x2x1
jax: 0.10.0
libtpu: 0.0.40
codegen_flags: <defaults>
</compile_context>

<pallas_src>
import functools

import jax
import jax.numpy as jnp
from jax.experimental import pallas as pl
from jax.experimental.pallas import tpu as pltpu

EPS = 1e-6


def _layernorm_kernel(x_ref, a_ref, b_ref, o_ref, *, features):
    # x_ref: (tile_rows, F); a_ref/b_ref: (1, F). Block last dim == full F, so
    # there are no padded/garbage lanes. Garbage rows in a partial edge block
    # only corrupt their own rows, whose stores Pallas masks out.
    x = x_ref[...].astype(jnp.float32)

    mean = jnp.sum(x, axis=-1, keepdims=True) * (1.0 / features)
    diff = x - mean

    # torch.std default: unbiased estimator (divide by F-1). For F == 1 this
    # yields NaN at runtime, matching torch.
    var = jnp.sum(diff * diff, axis=-1, keepdims=True) / float(features - 1)
    std = jnp.sqrt(var)

    # Per-row reciprocal of a (tile_rows, 1) column instead of a full-width
    # divide; approx=False keeps exact numerics (kernel is HBM-bound anyway).
    inv = pl.reciprocal(std + EPS, approx=False)

    a = a_ref[...].astype(jnp.float32)
    b = b_ref[...].astype(jnp.float32)
    o_ref[...] = ((diff * inv) * a + b).astype(o_ref.dtype)


def layer_norm(x, a_2, b_2, *, target_block_bytes=2 << 20):
    """LayerNorm over the last axis of x, matching the PyTorch module
    (unbiased std, eps added to std outside the sqrt)."""
    orig_shape = x.shape
    features = orig_shape[-1]
    x2 = x.reshape(-1, features)          # collapse leading dims (metadata only)
    n_rows = x2.shape[0]

    itemsize = jnp.dtype(x.dtype).itemsize
    row_align = {1: 32, 2: 16}.get(itemsize, 8)   # sublane packing per dtype

    # ---- row tile: fixed ~2 MiB input block on every generation -------------
    # (measured mem-bound roofline knee; independent of physical VMEM size so
    # v7x's 64 MiB VMEM does not shrink the tile).
    tile_rows = (target_block_bytes // max(features * itemsize, 1)) // row_align * row_align
    tile_rows = max(tile_rows, row_align)
    if n_rows <= tile_rows:
        tile_rows = n_rows            # single full-extent block (always legal)
    grid_steps = pl.cdiv(n_rows, tile_rows)

    a2 = a_2.reshape(1, features)
    b2 = b_2.reshape(1, features)

    # 3-deep buffering on the streaming operands only when there are enough
    # grid steps to profit from it (extra buffer hides DMA bubbles).
    if grid_steps >= 3:
        x_in_spec = pl.BlockSpec((tile_rows, features), lambda i: (i, 0),
                                 pipeline_mode=pl.Buffered(3))
        x_out_spec = pl.BlockSpec((tile_rows, features), lambda i: (i, 0),
                                  pipeline_mode=pl.Buffered(3))
        n_buf = 3
    else:
        x_in_spec = pl.BlockSpec((tile_rows, features), lambda i: (i, 0))
        x_out_spec = pl.BlockSpec((tile_rows, features), lambda i: (i, 0))
        n_buf = 2

    # ---- scoped-VMEM limit sized to the tiles, clamped for v7x headroom -----
    block_elems = tile_rows * features
    vmem_needed = (
        n_buf * block_elems * itemsize      # buffered input
        + n_buf * block_elems * itemsize    # buffered output
        + 4 * block_elems * 4               # f32 temporaries inside the block
        + 4 * features * 4                  # params (double-buffered, f32)
    )
    # <= 48 MiB so even a v7x TensorCore (64 MiB VMEM) keeps headroom for
    # Mosaic internal scratch; v5e/v6e (128 MiB) are unaffected.
    vmem_limit = int(min(max(vmem_needed + (4 << 20), 32 << 20), 48 << 20))

    out = pl.pallas_call(
        functools.partial(_layernorm_kernel, features=features),
        out_shape=jax.ShapeDtypeStruct((n_rows, features), x.dtype),
        grid_spec=pltpu.PrefetchScalarGridSpec(
            num_scalar_prefetch=0,
            grid=(grid_steps,),
            in_specs=[
                x_in_spec,
                pl.BlockSpec((1, features), lambda i: (0, 0)),
                pl.BlockSpec((1, features), lambda i: (0, 0)),
            ],
            out_specs=x_out_spec,
        ),
        compiler_params=pltpu.CompilerParams(
            dimension_semantics=("parallel",),   # lets v7x shard rows over 2 TCs
            vmem_limit_bytes=vmem_limit,
        ),
    )(x2, a2, b2)

    return out.reshape(orig_shape)


def _reference(x, a_2, b_2, eps=EPS):
    f = x.shape[-1]
    mean = jnp.mean(x, axis=-1, keepdims=True)
    std = jnp.sqrt(jnp.sum((x - mean) ** 2, axis=-1, keepdims=True) / (f - 1))
    return a_2 * (x - mean) / (std + eps) + b_2


if __name__ == "__main__":
    key = jax.random.PRNGKey(0)
    k1, k2 = jax.random.split(key)
    batch, seq, hidden = 2, 8, 32

    # Parameter init matching the module's __init__: a_2 = ones, b_2 = zeros.
    a_2 = jnp.ones((hidden,), dtype=jnp.float32)
    b_2 = jnp.zeros((hidden,), dtype=jnp.float32)

    # Single-block path (16 rows fit in one tile).
    x = jax.random.normal(k1, (batch, seq, hidden), dtype=jnp.float32)
    y = jax.block_until_ready(layer_norm(x, a_2, b_2))
    assert jnp.allclose(y, _reference(x, a_2, b_2), atol=1e-5, rtol=1e-5), \
        "mismatch vs reference (single-block path)"

    # Multi-step grid with a partial edge block and Buffered(3):
    # 70 rows, forced 16-row tiles -> 5 grid steps, last block has 6 rows.
    x_big = jax.random.normal(k2, (2, 35, hidden), dtype=jnp.float32)
    y_big = jax.block_until_ready(
        layer_norm(x_big, a_2, b_2, target_block_bytes=16 * hidden * 4))
    assert jnp.allclose(y_big, _reference(x_big, a_2, b_2), atol=1e-5, rtol=1e-5), \
        "mismatch vs reference (partial-block / Buffered(3) path)"

    print("KERNEL_OK")
</pallas_src>

<mosaic_0001>
module attributes {stable_mosaic.version = 11 : i64} {
  func.func @_layernorm_kernel(%arg0: i32, %arg1: memref<16x32xf32, #tpu.memory_space<vmem>>, %arg2: memref<1x32xf32, #tpu.memory_space<vmem>>, %arg3: memref<1x32xf32, #tpu.memory_space<vmem>>, %arg4: memref<16x32xf32, #tpu.memory_space<vmem>>) attributes {dimension_semantics = [#tpu.dimension_semantics<parallel>], iteration_bounds = array<i64: 1>, scalar_prefetch = 0 : i64, scratch_operands = 0 : i64, tpu.core_type = #tpu.core_type<tc>, window_params = [{transform_indices = @transform_0, window_bounds = array<i64: 16, 32>}, {pipeline_mode = #tpu.pipeline_mode<synchronous>, transform_indices = @transform_1, window_bounds = array<i64: 1, 32>}, {pipeline_mode = #tpu.pipeline_mode<synchronous>, transform_indices = @transform_2, window_bounds = array<i64: 1, 32>}, {transform_indices = @transform_3, window_bounds = array<i64: 16, 32>}]} {
    %c0 = arith.constant 0 : index
    %c0_0 = arith.constant 0 : index
    %0 = vector.load %arg1[%c0, %c0_0] : memref<16x32xf32, #tpu.memory_space<vmem>>, vector<16x32xf32>
    %cst = arith.constant dense<0.000000e+00> : vector<16xf32>
    %1 = vector.multi_reduction <add>, %0, %cst [1] : vector<16x32xf32> to vector<16xf32>
    %2 = vector.shape_cast %1 : vector<16xf32> to vector<16x1xf32>
    %cst_1 = arith.constant 3.125000e-02 : f32
    %3 = vector.broadcast %cst_1 : f32 to vector<16x1xf32>
    %4 = arith.mulf %2, %3 : vector<16x1xf32>
    %5 = vector.broadcast %4 : vector<16x1xf32> to vector<16x32xf32>
    %6 = arith.subf %0, %5 : vector<16x32xf32>
    %7 = arith.mulf %6, %6 : vector<16x32xf32>
    %cst_2 = arith.constant dense<0.000000e+00> : vector<16xf32>
    %8 = vector.multi_reduction <add>, %7, %cst_2 [1] : vector<16x32xf32> to vector<16xf32>
    %9 = vector.shape_cast %8 : vector<16xf32> to vector<16x1xf32>
    %cst_3 = arith.constant 3.100000e+01 : f32
    %10 = vector.broadcast %cst_3 : f32 to vector<16x1xf32>
    %11 = arith.divf %9, %10 : vector<16x1xf32>
    %12 = math.sqrt %11 : vector<16x1xf32>
    %cst_4 = arith.constant 9.99999997E-7 : f32
    %13 = vector.broadcast %cst_4 : f32 to vector<16x1xf32>
    %14 = arith.addf %12, %13 : vector<16x1xf32>
    %15 = tpu.reciprocal %14 : vector<16x1xf32> -> vector<16x1xf32>
    %c0_5 = arith.constant 0 : index
    %c0_6 = arith.constant 0 : index
    %16 = vector.load %arg2[%c0_5, %c0_6] : memref<1x32xf32, #tpu.memory_space<vmem>>, vector<1x32xf32>
    %c0_7 = arith.constant 0 : index
    %c0_8 = arith.constant 0 : index
    %17 = vector.load %arg3[%c0_7, %c0_8] : memref<1x32xf32, #tpu.memory_space<vmem>>, vector<1x32xf32>
    %18 = vector.broadcast %15 : vector<16x1xf32> to vector<16x32xf32>
    %19 = arith.mulf %6, %18 : vector<16x32xf32>
    %20 = vector.broadcast %16 : vector<1x32xf32> to vector<16x32xf32>
    %21 = arith.mulf %19, %20 : vector<16x32xf32>
    %22 = vector.broadcast %17 : vector<1x32xf32> to vector<16x32xf32>
    %23 = arith.addf %21, %22 : vector<16x32xf32>
    %c0_9 = arith.constant 0 : index
    %c0_10 = arith.constant 0 : index
    %24 = vector.load %arg4[%c0_9, %c0_10] : memref<16x32xf32, #tpu.memory_space<vmem>>, vector<16x32xf32>
    tpu.vector_store %arg4[%c0_9, %c0_10], %23 {strides = array<i32>} : memref<16x32xf32, #tpu.memory_space<vmem>>, vector<16x32xf32>,
    return
  }
  func.func @transform_0(%arg0: i32) -> (i32, i32) {
    %c0_i32 = arith.constant 0 : i32
    %c0_i32_0 = arith.constant 0 : i32
    return %arg0, %c0_i32 : i32, i32
  }
  func.func @transform_1(%arg0: i32) -> (i32, i32) {
    %c0_i32 = arith.constant 0 : i32
    %c0_i32_0 = arith.constant 0 : i32
    %c0_i32_1 = arith.constant 0 : i32
    return %c0_i32, %c0_i32_0 : i32, i32
  }
  func.func @transform_2(%arg0: i32) -> (i32, i32) {
    %c0_i32 = arith.constant 0 : i32
    %c0_i32_0 = arith.constant 0 : i32
    %c0_i32_1 = arith.constant 0 : i32
    return %c0_i32, %c0_i32_0 : i32, i32
  }
  func.func @transform_3(%arg0: i32) -> (i32, i32) {
    %c0_i32 = arith.constant 0 : i32
    %c0_i32_0 = arith.constant 0 : i32
    return %arg0, %c0_i32 : i32, i32
  }
}

</mosaic_0001>

<bundles_post_ra>
// kernel: tpu_custom_call.1
= control target key start
LH: loop header
LB: loop body
LE: loop exit
PB: predicated region body
PF: predicated region fallthrough
CT: control target
= control target key end

     0   :  { %8 = vsyncpa [#allocation3], 0  ;;  %s216_s0 = inlined_call_operand.hbm [shape: f32[16,32], index: 0, kind: input, shape index: {}]   ;;  %s217_s1 = inlined_call_operand.vmem [shape: f32[1,32], index: 1, kind: input, shape index: {}]   ;;  %s218_s2 = inlined_call_operand.vmem [shape: f32[1,32], index: 2, kind: input, shape index: {}]   ;;  %s219_s3 = inlined_call_operand.hbm [shape: f32[16,32], index: 3, kind: output, shape index: {}]  }
   0x1   :  { %9 = vsyncpa [#allocation4], 0  ;;  %s168_s12 = smov [#allocation2]  }
   0x2   :  { %s15_s13 = sshll.u32 %s168_s12, 4  ;;  %s16_s13 = int_to_ptr.vmem [resolvable:$true] %s15_s13 }
   0x3   :  { %s132_s14 = scalar_lea.vmem %s16_s13, 256  ;;  %p137_p1 = scmp.lt.s32.totalorder %s16_s13, %s16_s13 }
   0x4   :  { %p133_p0 = scmp.ne.s32.totalorder %s16_s13, %s132_s14  ;;  %p138_p2 = scmp.lt.s32.totalorder %s132_s14, %s132_s14 }
   0x6   :  { %p139_p3 = por %p138_p2, %p137_p1 }
   0x8   :  { %p140_p4 = pnand %p139_p3, %p133_p0 }
   0xa   :  { %143 = shalt.err (!%p140_p4)
}
   0xb   :  { %s169_s15 = smov 128   ;;  %s170_s16 = smov 8  }
   0xc   :  { %21 = dma.hbm_to_vmem [thread:$0]  %s216_s0, 256, %s16_s13, [#allocation3], %s169_s15, %s169_s15, %s170_s16  }
   0xd   :  { %164 = dma.done.wait [#allocation3], 256  }
   0xe   :  { %165 = vsyncadd [#allocation3], 4294967040  ;;  %vm31_vm0 = vcmask 261120   ;;  %v29_v0 = vld [vmem:[#allocation2] sm:$0xff]  ;;  %v30_v1 = vld [vmem:[#allocation2 + $0x8] sm:$0xff]  ;;  %s171_s22 = smov [#allocation5]  }
   0xf   :  { %v32_v2 = vsel %vm31_vm0, %v29_v0, 0.0  ;;  %v35_v3 = vsel %vm31_vm0, %v30_v1, 0.0  ;;  %v110_v31 = vld [vmem:[%s217_s1] ss:$0 sm:$0xff]  ;;  %s98_s23 = sshll.u32 %s171_s22, 4  ;;  %s99_s23 = int_to_ptr.vmem [resolvable:$true] %s98_s23 }
  0x10   :  { %33 = vadd.xlane.f32.xlu0 %v32_v2  ;;  %v111_v33 = vld [vmem:[%s218_s2] ss:$0 sm:$0xff]  ;;  %s144_s24 = scalar_lea.vmem %s99_s23, 256  ;;  %p149_p6 = scmp.lt.s32.totalorder %s99_s23, %s99_s23 }
  0x11   :  { %p145_p5 = scmp.ne.s32.totalorder %s99_s23, %s144_s24  ;;  %p150_p7 = scmp.lt.s32.totalorder %s144_s24, %s144_s24 }
  0x13   :  { %p151_p8 = por %p150_p7, %p149_p6 }
  0x14   :  { %36 = vadd.xlane.f32.xlu0 %v35_v3 }
  0x15   :  { %p152_p9 = pnand %p151_p8, %p145_p5 }
  0x99   :  { %v34_v4 = vpop.xlane.xlu0 %33 }
  0x9a   :  { %v38_v5 = vmul.f32 0.03125, %v34_v4 }
  0x9c   :  { %v40_v6 = vsub.f32 %v29_v0, %v38_v5 }
  0x9d   :  { %v37_v7 = vpop.xlane.xlu0 %36 }
  0x9e   :  { %v39_v8 = vmul.f32 0.03125, %v37_v7  ;;  %v42_v9 = vmul.f32 %v40_v6, %v40_v6 }
  0xa0   :  { %v41_v10 = vsub.f32 %v30_v1, %v39_v8  ;;  %v44_v11 = vsel %vm31_vm0, %v42_v9, 0.0 }
  0xa1   :  { %45 = vadd.xlane.f32.xlu1 %v44_v11 }
  0xa2   :  { %v43_v12 = vmul.f32 %v41_v10, %v41_v10 }
  0xa4   :  { %v47_v13 = vsel %vm31_vm0, %v43_v12, 0.0 }
  0xa5   :  { %48 = vadd.xlane.f32.xlu1 %v47_v13 }
 0x12a   :  { %v46_v14 = vpop.xlane.xlu1 %45 }
 0x12b   :  { %v51_v15 = vmul.f32 0.032258064, %v46_v14 }
 0x12d   :  { %116 = vrsqrt.f32 %v51_v15  ;;  %vm55_vm1 = vcmp.eq.f32.partialorder %v51_v15, inf  ;;  %v58_v20 = vand.u32 2147483648, %v51_v15  ;;  %vm57_vm2 = vcmp.eq.f32.partialorder %v51_v15, 0.0 }
 0x12e   :  { %v49_v16 = vpop.xlane.xlu1 %48 }
 0x12f   :  { %v52_v17 = vmul.f32 0.032258064, %v49_v16 }
 0x131   :  { %118 = vrsqrt.f32 %v52_v17  ;;  %vm62_vm3 = vcmp.eq.f32.partialorder %v52_v17, inf  ;;  %v65_v26 = vand.u32 2147483648, %v52_v17  ;;  %vm64_vm4 = vcmp.eq.f32.partialorder %v52_v17, 0.0 }
 0x13a   :  { %v117_v18 = vpop.eup %116 }
 0x13b   :  { %v54_v19 = vmul.f32 %v117_v18, %v51_v15 }
 0x13d   :  { %v56_v21 = vsel %vm55_vm1, %v51_v15, %v54_v19 }
 0x13e   :  { %v119_v22 = vpop.eup %118  ;;  %v59_v23 = vsel %vm57_vm2, %v58_v20, %v56_v21 }
 0x13f   :  { %v67_v24 = vadd.f32 1e-06, %v59_v23  ;;  %v61_v25 = vmul.f32 %v119_v22, %v52_v17 }
 0x141   :  { %120 = vrcp.f32 %v67_v24  ;;  %v63_v27 = vsel %vm62_vm3, %v52_v17, %v61_v25 }
 0x142   :  { %v66_v28 = vsel %vm64_vm4, %v65_v26, %v63_v27 }
 0x143   :  { %v68_v29 = vadd.f32 1e-06, %v66_v28 }
 0x145   :  { %122 = vrcp.f32 %v68_v29 }
 0x14e   :  { %v121_v30 = vpop.eup %120 }
 0x14f   :  { %v73_v32 = vmul.f32 %v121_v30, %v40_v6 }
 0x151   :  { %v81_v34 = vmul.f32 %v110_v31, %v73_v32 }
 0x152   :  { %v123_v35 = vpop.eup %122 }
 0x153   :  { %v74_v36 = vmul.f32 %v123_v35, %v41_v10  ;;  %v89_v37 = vadd.f32 %v111_v33, %v81_v34 }
 0x155   :  { %v82_v38 = vmul.f32 %v110_v31, %v74_v36  ;;  %91 = vst.msk [vmem:[#allocation5] sm:$0xff] %vm31_vm0, %v89_v37 }
 0x157   :  { %v90_v39 = vadd.f32 %v111_v33, %v82_v38 }
 0x159   :  { %92 = vst.msk [vmem:[#allocation5 + $0x8] sm:$0xff] %vm31_vm0, %v90_v39 }
 0x15a   :  { %155 = shalt.err (!%p152_p9)
}
 0x15b   :  { %104 = dma.vmem_to_hbm [thread:$0]  %s99_s23, 256, %s219_s3, [#allocation4], %s169_s15, %s169_s15, %s170_s16  }
 0x15c   :  { %166 = dma.done.wait [#allocation4], 256  }
 0x15d   :  { %167 = vsyncadd [#allocation4], 4294967040 }
 0x15e   :  { %108 = vsyncpa [#allocation3], 1 }
 0x15f   :  { %109 = vsyncpa [#allocation4], 1 }

</bundles_post_ra>
